<compile_context>
chip_gen: v5e
topology: v5e:2x2
jax: 0.10.0
libtpu: 0.0.40
codegen_flags: <defaults>
</compile_context>

<pallas_src>
import jax
import jax.numpy as jnp
from jax.experimental import pallas as pl
from jax.experimental.pallas import tpu as pltpu


# ---------------------------------------------------------------------------
# Path 1: row-gather kernel (moves only the B*S needed embedding rows).
# ---------------------------------------------------------------------------
def _gather_kernel(tok_ref, qlen_ref, row_ref, out_ref):
    del tok_ref  # only consumed by the BlockSpec index_maps (scalar prefetch)
    s = pl.program_id(1)
    n_s = pl.num_programs(1)

    @pl.when(s == 0)
    def _init():
        out_ref[...] = jnp.zeros_like(out_ref)

    # (1, 1, F) embedding row, accumulated into the resident f32 output block.
    out_ref[...] += row_ref[...].astype(jnp.float32)

    @pl.when(s == n_s - 1)
    def _finalize():
        inv_len = pl.reciprocal(qlen_ref[...] + 1e-12, approx=False)  # (1,1,1)
        out_ref[...] = out_ref[...] * inv_len


def _bow_gather(q, q_len, emb):
    B, S = q.shape
    V, F = emb.shape
    tok = q.reshape(-1)                 # (B*S,) int32 -> SMEM scalar prefetch
    qlen3 = q_len.reshape(B, 1, 1)
    emb3 = emb.reshape(V, 1, F)         # leading dim indexed per token id

    grid_spec = pltpu.PrefetchScalarGridSpec(
        num_scalar_prefetch=1,
        grid=(B, S),                    # reduction axis (S) last
        in_specs=[
            pl.BlockSpec((1, 1, 1), lambda b, s, tok: (b, 0, 0)),               # q_len
            pl.BlockSpec((1, 1, F), lambda b, s, tok: (tok[b * S + s], 0, 0)),  # emb row
        ],
        out_specs=pl.BlockSpec((1, 1, F), lambda b, s, tok: (b, 0, 0)),  # resident over s
    )

    out = pl.pallas_call(
        _gather_kernel,
        out_shape=jax.ShapeDtypeStruct((B, 1, F), jnp.float32),
        grid_spec=grid_spec,
        compiler_params=pltpu.CompilerParams(
            dimension_semantics=("parallel", "arbitrary"),   # b split across v7x cores
            vmem_limit_bytes=16 << 20,                       # tiny footprint; safe on all gens
        ),
    )(tok, qlen3, emb3)
    return out.reshape(B, F)


# ---------------------------------------------------------------------------
# Path 2: dense counts @ E kernel (full-row contiguous table stream).
# ---------------------------------------------------------------------------
def _dense_kernel(q_ref, qlen_ref, emb_ref, out_ref):
    k = pl.program_id(1)                 # vocab (reduction) step — inner grid axis
    n_k = pl.num_programs(1)

    @pl.when(k == 0)
    def _init():
        out_ref[...] = jnp.zeros_like(out_ref)

    q = q_ref[...]                       # (B, S) int32, resident in VMEM
    B, S = q.shape
    tile_v = emb_ref.shape[0]

    # counts[b, v] = #{s : q[b, s] == k*tile_v + v}: one vectorized compare
    # against a lane iota + XLU sublane reduce over the sequence axis.
    # TODO(synk): when num_f_blocks > 1, cache counts per k in a VMEM scratch
    # instead of rebuilding them for every F block.
    v_start = k * tile_v
    local = (q - v_start)[:, :, None]                                    # (B, S, 1)
    lane_ids = jax.lax.broadcasted_iota(jnp.int32, (B, S, tile_v), 2)    # (B, S, Tv)
    counts = jnp.sum((local == lane_ids).astype(jnp.float32), axis=1)    # (B, Tv)

    # Partial sum over this vocab tile: one MXU matmul, f32 accumulation,
    # accumulated directly into the resident f32 output block (no scratch).
    out_ref[...] += jnp.dot(counts.astype(emb_ref.dtype), emb_ref[...],
                            preferred_element_type=jnp.float32)

    @pl.when(k == n_k - 1)
    def _finalize():
        inv_len = pl.reciprocal(qlen_ref[...] + 1e-12, approx=False)     # (B, 1)
        out_ref[...] = out_ref[...] * inv_len


def _pick_tile_v(V, row_bytes, target_bytes=4 << 20):
    """Largest multiple-of-8 divisor of V whose (tile_v, F) tile is ~<= target."""
    max_rows = max(8, target_bytes // row_bytes)
    if V <= max_rows:
        return V
    cand = int(max_rows) - int(max_rows) % 8
    while cand >= 8:
        if V % cand == 0:
            return cand
        cand -= 8
    # TODO(synk): pad V / mask the ragged tail instead of falling back to the
    # full table when V has no suitable divisor.
    return V


def _bow_dense(q, q_len, emb, *, num_f_blocks=1):
    B, S = q.shape
    V, F = emb.shape

    n_f = num_f_blocks
    if F % n_f != 0 or (n_f > 1 and (F // n_f) % 128 != 0):
        n_f = 1                          # full-row tiles (single-TC optimal anyway)
    tile_f = F // n_f

    itemsize = emb.dtype.itemsize
    tile_v = _pick_tile_v(V, tile_f * itemsize)
    n_v = V // tile_v

    grid_spec = pltpu.PrefetchScalarGridSpec(
        num_scalar_prefetch=0,
        grid=(n_f, n_v),                                             # reduction axis last
        in_specs=[
            pl.BlockSpec((B, S), lambda f, k: (0, 0)),               # q      (resident)
            pl.BlockSpec((B, 1), lambda f, k: (0, 0)),               # q_len  (resident)
            pl.BlockSpec((tile_v, tile_f), lambda f, k: (k, f)),     # contiguous tiles
        ],
        out_specs=pl.BlockSpec((B, tile_f), lambda f, k: (0, f)),    # resident over k
    )

    # Double-buffered emb tile + one-hot temp + resident bits, with headroom;
    # stays well under v7x's 64 MiB physical VMEM.
    emb_tile_bytes = tile_v * tile_f * itemsize
    onehot_bytes = B * S * tile_v * 4
    vmem_limit = 2 * emb_tile_bytes + onehot_bytes + 2 * B * tile_f * 4 + (4 << 20)
    vmem_limit = int(min(max(vmem_limit, 8 << 20), 48 << 20))

    return pl.pallas_call(
        _dense_kernel,
        out_shape=jax.ShapeDtypeStruct((B, F), jnp.float32),
        grid_spec=grid_spec,
        compiler_params=pltpu.CompilerParams(
            dimension_semantics=("parallel", "arbitrary"),
            vmem_limit_bytes=vmem_limit,
        ),
    )(q, q_len, emb)


# ---------------------------------------------------------------------------
# Public entry point (matches BagOfWordsProcessor.forward semantics).
# ---------------------------------------------------------------------------
def bag_of_words_processor(q, q_len, emb, *, path=None, num_f_blocks=1):
    """q: (B, S) int token ids, q_len: (B,) or (B, 1), emb: (V, F) -> (B, F) f32.

    path: None (auto), "gather", or "dense".
    num_f_blocks: F split for the dense path (set 2 on v7x megacore; 1 elsewhere).
    """
    B, S = q.shape
    V, F = emb.shape
    q = q.astype(jnp.int32)
    q_len = jnp.asarray(q_len, jnp.float32).reshape(B, 1)

    if path is None:
        # Gather moves B*S rows, dense moves all V rows: gather wins whenever
        # the questions are much shorter than the vocabulary (the normal case).
        path = "gather" if 2 * B * S <= V else "dense"

    if path == "gather":
        return _bow_gather(q, q_len, emb)
    return _bow_dense(q, q_len, emb, num_f_blocks=num_f_blocks)


if __name__ == "__main__":
    def reference(q, q_len, emb):
        return jnp.take(emb, q, axis=0).sum(axis=1) / (q_len.reshape(-1, 1) + 1e-12)

    key = jax.random.PRNGKey(0)
    k_q, k_len, k_emb, k_q2, k_len2, k_emb2 = jax.random.split(key, 6)

    # --- main toy shape: exercise both paths --------------------------------
    B, S, V, F = 8, 8, 512, 256
    q = jax.random.randint(k_q, (B, S), 0, V, dtype=jnp.int32)
    q_len = jax.random.randint(k_len, (B,), 1, S + 1).astype(jnp.float32)
    emb = jax.random.normal(k_emb, (V, F), dtype=jnp.float32)
    ref = reference(q, q_len, emb)

    out_g = jax.block_until_ready(bag_of_words_processor(q, q_len, emb, path="gather"))
    assert out_g.shape == (B, F)
    assert jnp.allclose(out_g, ref, atol=1e-5, rtol=1e-5), "gather path mismatch"

    out_d = jax.block_until_ready(bag_of_words_processor(q, q_len, emb, path="dense"))
    assert jnp.allclose(out_d, ref, atol=1e-5, rtol=1e-5), "dense path mismatch"

    # --- ragged (GloVe-like) shape: gather path has no divisibility needs ---
    B2, S2, V2, F2 = 8, 8, 1000, 200
    q2 = jax.random.randint(k_q2, (B2, S2), 0, V2, dtype=jnp.int32)
    q_len2 = jax.random.randint(k_len2, (B2,), 1, S2 + 1).astype(jnp.float32)
    emb2 = jax.random.normal(k_emb2, (V2, F2), dtype=jnp.float32)
    out2 = jax.block_until_ready(bag_of_words_processor(q2, q_len2, emb2))  # auto -> gather
    assert jnp.allclose(out2, reference(q2, q_len2, emb2), atol=1e-5, rtol=1e-5), \
        "ragged gather mismatch"

    print("KERNEL_OK")
</pallas_src>

<mosaic_0001>
module attributes {stable_mosaic.version = 11 : i64} {
  func.func @_gather_kernel(%arg0: i32, %arg1: i32, %arg2: memref<64xi32, #tpu.memory_space<smem>>, %arg3: memref<1x1x1xf32, #tpu.memory_space<vmem>>, %arg4: memref<1x1x256xf32, #tpu.memory_space<vmem>>, %arg5: memref<1x1x256xf32, #tpu.memory_space<vmem>>) attributes {dimension_semantics = [#tpu.dimension_semantics<parallel>, #tpu.dimension_semantics<arbitrary>], iteration_bounds = array<i64: 8, 8>, scalar_prefetch = 1 : i64, scratch_operands = 0 : i64, tpu.core_type = #tpu.core_type<tc>, window_params = [{transform_indices = @transform_0, window_bounds = array<i64: 1, 1, 1>}, {transform_indices = @transform_1, window_bounds = array<i64: 1, 1, 256>}, {transform_indices = @transform_2, window_bounds = array<i64: 1, 1, 256>}]} {
    %c0_i32 = arith.constant 0 : i32
    %0 = arith.cmpi eq, %arg1, %c0_i32 : i32
    %1 = arith.extui %0 : i1 to i32
    %c0_i32_0 = arith.constant 0 : i32
    %2 = arith.cmpi ne, %1, %c0_i32_0 : i32
    scf.if %2 {
      %cst = arith.constant 0.000000e+00 : f32
      %10 = vector.broadcast %cst : f32 to vector<1x1x256xf32>
      %c0_10 = arith.constant 0 : index
      %c0_11 = arith.constant 0 : index
      %c0_12 = arith.constant 0 : index
      %11 = vector.load %arg5[%c0_10, %c0_11, %c0_12] : memref<1x1x256xf32, #tpu.memory_space<vmem>>, vector<1x1x256xf32>
      tpu.vector_store %arg5[%c0_10, %c0_11, %c0_12], %10 {strides = array<i32>} : memref<1x1x256xf32, #tpu.memory_space<vmem>>, vector<1x1x256xf32>,
    } else {
    }
    %c0 = arith.constant 0 : index
    %c0_1 = arith.constant 0 : index
    %c0_2 = arith.constant 0 : index
    %3 = vector.load %arg5[%c0, %c0_1, %c0_2] : memref<1x1x256xf32, #tpu.memory_space<vmem>>, vector<1x1x256xf32>
    %c0_3 = arith.constant 0 : index
    %c0_4 = arith.constant 0 : index
    %c0_5 = arith.constant 0 : index
    %4 = vector.load %arg4[%c0_3, %c0_4, %c0_5] : memref<1x1x256xf32, #tpu.memory_space<vmem>>, vector<1x1x256xf32>
    %5 = arith.addf %3, %4 : vector<1x1x256xf32>
    %c0_6 = arith.constant 0 : index
    %c0_7 = arith.constant 0 : index
    %c0_8 = arith.constant 0 : index
    %6 = vector.load %arg5[%c0_6, %c0_7, %c0_8] : memref<1x1x256xf32, #tpu.memory_space<vmem>>, vector<1x1x256xf32>
    tpu.vector_store %arg5[%c0_6, %c0_7, %c0_8], %5 {strides = array<i32>} : memref<1x1x256xf32, #tpu.memory_space<vmem>>, vector<1x1x256xf32>,
    %c7_i32 = arith.constant 7 : i32
    %7 = arith.cmpi eq, %arg1, %c7_i32 : i32
    %8 = arith.extui %7 : i1 to i32
    %c0_i32_9 = arith.constant 0 : i32
    %9 = arith.cmpi ne, %8, %c0_i32_9 : i32
    scf.if %9 {
      %c0_10 = arith.constant 0 : index
      %c0_11 = arith.constant 0 : index
      %c0_12 = arith.constant 0 : index
      %10 = vector.load %arg3[%c0_10, %c0_11, %c0_12] : memref<1x1x1xf32, #tpu.memory_space<vmem>>, vector<1x1x1xf32>
      %cst = arith.constant 9.99999996E-13 : f32
      %11 = vector.broadcast %cst : f32 to vector<1x1x1xf32>
      %12 = arith.addf %10, %11 : vector<1x1x1xf32>
      %13 = tpu.reciprocal %12 : vector<1x1x1xf32> -> vector<1x1x1xf32>
      %c0_13 = arith.constant 0 : index
      %c0_14 = arith.constant 0 : index
      %c0_15 = arith.constant 0 : index
      %14 = vector.load %arg5[%c0_13, %c0_14, %c0_15] : memref<1x1x256xf32, #tpu.memory_space<vmem>>, vector<1x1x256xf32>
      %15 = vector.broadcast %13 : vector<1x1x1xf32> to vector<1x1x256xf32>
      %16 = arith.mulf %14, %15 : vector<1x1x256xf32>
      %c0_16 = arith.constant 0 : index
      %c0_17 = arith.constant 0 : index
      %c0_18 = arith.constant 0 : index
      %17 = vector.load %arg5[%c0_16, %c0_17, %c0_18] : memref<1x1x256xf32, #tpu.memory_space<vmem>>, vector<1x1x256xf32>
      tpu.vector_store %arg5[%c0_16, %c0_17, %c0_18], %16 {strides = array<i32>} : memref<1x1x256xf32, #tpu.memory_space<vmem>>, vector<1x1x256xf32>,
    } else {
    }
    return
  }
  func.func @transform_0(%arg0: i32, %arg1: i32, %arg2: memref<64xi32, #tpu.memory_space<smem>>) -> (i32, i32, i32) {
    %c0_i32 = arith.constant 0 : i32
    %c0_i32_0 = arith.constant 0 : i32
    %c0_i32_1 = arith.constant 0 : i32
    return %arg0, %c0_i32, %c0_i32_0 : i32, i32, i32
  }
  func.func @transform_1(%arg0: i32, %arg1: i32, %arg2: memref<64xi32, #tpu.memory_space<smem>>) -> (i32, i32, i32) {
    %c8_i32 = arith.constant 8 : i32
    %0 = arith.muli %arg0, %c8_i32 : i32
    %1 = arith.addi %0, %arg1 : i32
    %2 = arith.index_cast %1 : i32 to index
    %3 = memref.load %arg2[%2] : memref<64xi32, #tpu.memory_space<smem>>
    %c0_i32 = arith.constant 0 : i32
    %c0_i32_0 = arith.constant 0 : i32
    %c0_i32_1 = arith.constant 0 : i32
    return %3, %c0_i32, %c0_i32_0 : i32, i32, i32
  }
  func.func @transform_2(%arg0: i32, %arg1: i32, %arg2: memref<64xi32, #tpu.memory_space<smem>>) -> (i32, i32, i32) {
    %c0_i32 = arith.constant 0 : i32
    %c0_i32_0 = arith.constant 0 : i32
    %c0_i32_1 = arith.constant 0 : i32
    return %arg0, %c0_i32, %c0_i32_0 : i32, i32, i32
  }
}

</mosaic_0001>

<bundles_post_ra>
// kernel: tpu_custom_call.1
= control target key start
LH: loop header
LB: loop body
LE: loop exit
PB: predicated region body
PF: predicated region fallthrough
CT: control target
= control target key end

     0   :  { %s658_s15 = smov [#allocation3]   ;;  %s900_s0 = inlined_call_operand.vmem [shape: s32[64], index: 0, kind: input, shape index: {}]   ;;  %s901_s1 = inlined_call_operand.vmem [shape: f32[8,1,1], index: 1, kind: input, shape index: {}]   ;;  %s902_s2 = inlined_call_operand.hbm [shape: f32[512,1,256], index: 2, kind: input, shape index: {}]   ;;  %s903_s3 = inlined_call_operand.hbm [shape: f32[8,1,256], index: 3, kind: output, shape index: {}]  }
   0x1   :  { %s9_s14 = sshll.u32 %s900_s0, 4  ;;  %s10_s14 = int_to_ptr.vmem [resolvable:$true] %s9_s14 }
   0x2   :  { %12 = dma.vmem_to_smem %s10_s14, 16, %s658_s15, [#allocation2] }
   0x3   :  { %604 = dma.done.wait [#allocation2], 16 }
   0x4   :  { %605 = vsyncadd [#allocation2], 4294967280 }
   0x5   :  { %15 = sfence }
   0x6   :  { %16 = vsyncpa [#allocation5], 0 }
   0x7   :  { %18 = vsyncpa [#allocation5 + $0x1], 0 }
   0x8   :  { %19 = vsyncpa [#allocation6], 0 }
   0x9   :  { %21 = vsyncpa [#allocation6 + $0x1], 0  ;;  %s684_s16 = smov 0   ;;  %s686_s17 = smov 0  }
   0xa   :  { %s688_s18 = smov 0   ;;  %s690_s19 = smov 0  }
   0xb   :  { %s692_s20 = smov 0   ;;  %s694_s0 = smov 0  }
   0xc   :  { %s696_s21 = smov 0   ;;  %s698_s22 = smov 0  }
   0xd   :  { %s700_s23 = smov 0   ;;  %s702_s24 = smov 0  }
   0xe   :  { %s704_s25 = smov 0  }
   0xf LB: > { %909 = sst [smem:[#allocation13_spill]] %s636_s0  ;;  %s360_s26 = sadd.s32 4294967295, %s656_s25   ;;  %s656_s25 = sphi %s704_s25, %s27_s25   ;;  %s652_s24 = sphi %s702_s24, %s927_s24   ;;  %s648_s23 = sphi %s700_s23, %s926_s23   ;;  %s644_s22 = sphi %s698_s22, %s925_s22   ;;  %s640_s21 = sphi %s696_s21, %s924_s21   ;;  %s636_s0 = sphi %s694_s0, %s923_s0   ;;  %s632_s20 = sphi %s692_s20, %s932_s20   ;;  %s628_s19 = sphi %s690_s19, %s931_s19   ;;  %s624_s18 = sphi %s688_s18, %s930_s18   ;;  %s620_s17 = sphi %s686_s17, %s929_s17   ;;  %s616_s16 = sphi %s684_s16, %s928_s16  }
  0x10   : > { %910 = sst [smem:[#allocation14_spill]] %s648_s23  ;;  %s36_s27 = sadd.s32 1, %s648_s23 }
  0x11   : > { %911 = sst [smem:[#allocation15_spill]] %s652_s24  ;;  %s39_s28 = sadd.s32 1, %s652_s24 }
  0x12   : > { %p37_p0 = scmp.ge.s32.totalorder %s36_s27, 8  ;;  %s362_s29 = sshll.u32 %s652_s24, 3 }
  0x13   : > { %s361_s30 = sadd.s32 4294967294, %s656_s25   ;;  %s743_s4 = sadd.s32 %s648_s23, %s362_s29 }
  0x14   : > { %s934_s27 = smov (%p37_p0, %s36_s27), 0  ;;  %s936_s28 = smov (!%p37_p0, %s39_s28), %s652_s24 }
  0x15   : > { %912 = sst [smem:[#allocation16_spill]] %s934_s27  ;;  %s78_s6 = sadd.s32 1, %s636_s0 }
  0x16   : > { %s71_s5 = sld [smem:[#allocation3 + %s743_s4]]  ;;  %p41_p1 = scmp.ge.s32.totalorder %s936_s28, 8 }
  0x17   : > { %p85_p2 = scmp.ne.s32.totalorder %s636_s0, %s632_s20  ;;  %p91_p3 = scmp.ne.s32.totalorder %s632_s20, %s628_s19 }
  0x18   : > { %p92_p4 = scmp.eq.s32.totalorder %s360_s26, 0  ;;  %s938_s28 = smov (%p41_p1, %s936_s28), 0 }
  0x19   : > { %913 = sst [smem:[#allocation17_spill]] %s938_s28  ;;  %p86_p5 = scmp.eq.s32.totalorder %s656_s25, 0 }
  0x1a   : > { %p756_p6 = por %p92_p4, %p91_p3  ;;  %s363_s8 = sshll.u32 %s938_s28, 3 }
  0x1b   : > { %s101_s9 = ssub.s32 %s652_s24, %s938_s28  ;;  %s73_s10 = sadd.s32 %s363_s8, %s934_s27 }
  0x1c   : > { %p102_p7 = scmp.eq.s32.totalorder %s101_s9, 0  ;;  %s74_s11 = sld [smem:[#allocation3 + %s73_s10]] }
  0x1d   : > { %s104_s12 = sadd.s32 1, %s624_s18  ;;  %p114_p8 = scmp.ne.s32.totalorder %s624_s18, %s620_s17 }
  0x1e   : > { %s766_s13 = scalar_select %p102_p7, %s624_s18, %s104_s12  }
  0x1f   : > { %p115_p9 = scmp.eq.s32.totalorder %s360_s26, 63  ;;  %p120_p10 = scmp.ne.s32.totalorder %s620_s17, %s616_s16 }
  0x20   : > { %p121_p11 = scmp.eq.s32.totalorder %s361_s30, 63  ;;  %p87_p13 = por %p86_p5, %p85_p2 }
  0x21   : > { %p772_p12 = por %p115_p9, %p114_p8  ;;  %p394_p1 = scmp.lt.s32.totalorder %s656_s25, 64 }
  0x22   : > { %p781_p0 = por %p121_p11, %p120_p10  ;;  %s75_s19 = ssub.s32 %s71_s5, %s74_s11 }
  0x23   : > { %p76_p3 = scmp.eq.s32.totalorder %s75_s19, 0  ;;  %s147_s29 = sand.u32 1, %s636_s0  }
  0x24   : > { %p787_p4 = pnand %p394_p1, %p87_p13  ;;  %s366_s8 = sshll.u32 %s147_s29, 1 }
  0x25   : > { %s792_s30 = scalar_select %p76_p3, %s636_s0, %s78_s6  }
  0x26   : > { %s378_s9 = scalar_select %p87_p13, [#allocation3], [#allocation8] }
  0x27   : > { %918 = sst [smem:[#allocation18_spill]] %s792_s30  ;;  %s940_s4 = smov (!%p87_p13, %s743_s4), 0 }
  0x28   : > { %s942_s9 = smov (!%p394_p1, %s378_s9), [#allocation9]  ;;  %s944_s4 = smov (!%p394_p1, %s940_s4), 0 }
  0x29   : > { %p369_p2 = scmp.ge.s32.totalorder %s656_s25, 1  ;;  %s154_s10 = sld [smem:[%s942_s9 + %s944_s4]] }
  0x2a   : > { %p167_p5 = scmp.lt.s32.totalorder %s656_s25, 65  ;;  %s151_s11 = scalar_lea.vmem [#allocation4], %s366_s8 }
  0x2b   : > { %s162_s12 = sshll.u32 %s151_s11, 4  ;;  %s148_s23 = scalar_lea.sflag [#allocation5], %s147_s29  ;;  %s163_s12 = int_to_ptr.vmem [resolvable:$true] %s162_s12 }
  0x2c   : > { %p797_p7 = pnand %p369_p2, %p167_p5  ;;  %p506_p9 = pneg %p787_p4 }
  0x2d   : > { %s509_s9 = scalar_lea.hbm %s902_s2, 1024 }
  0x2f   : > { %s368_s19 = sshll.u32 %s154_s10, 1 }
  0x30   : > { %s158_s6 = scalar_lea.hbm %s902_s2, %s368_s19 }
  0x31   : > { %s160_s24 = sshll.u32 %s158_s6, 4  ;;  %s161_s24 = int_to_ptr.hbm [resolvable:$true] %s160_s24 }
  0x32   : > { %s502_s30 = sshra.s32 %s161_s24, 4  ;;  %s503_s30 = int_to_ptr.hbm [resolvable:$true] %s502_s30 }
  0x33   : > { %s504_s0 = scalar_lea.hbm %s503_s30, 2  ;;  %p510_p13 = scmp.lt.s32.totalorder %s503_s30, %s902_s2 }
  0x34   : > { %p505_p8 = scmp.ne.s32.totalorder %s503_s30, %s504_s0  ;;  %p511_p1 = scmp.lt.s32.totalorder %s509_s9, %s504_s0 }
  0x36   : > { %p507_p10 = pnand %p506_p9, %p505_p8  ;;  %p512_p3 = por %p511_p1, %p510_p13 }
  0x38   : > { %p508_p11 = pneg %p507_p10 }
  0x3a   : > { %p513_p2 = pnand %p512_p3, %p508_p11 }
  0x3c   : > { %516 = shalt.err (!%p513_p2)
}
  0x3d   : > { %389 = dma.hbm_to_vmem [thread:$0]  (!%p787_p4), %s161_s24, 32, %s163_s12, %s148_s23  }
  0x3e   : > { %171 = sbr.rel (%p797_p7) target bundleno = 245 (0xf5), region = 28  ;;  %s173_s27 = sand.u32 (!%p797_p7), 1, %s632_s20  }
  0x3f   : > { %s370_s28 = sshll.u32 (!%p797_p7), %s173_s27, 1  ;;  %s174_s29 = scalar_lea.sflag (!%p797_p7), [#allocation5], %s173_s27 }
  0x40   : > { %s177_s19 = scalar_lea.vmem (!%p797_p7), [#allocation4], %s370_s28 }
  0x43   : > { %607 = dma.done.wait (%p756_p6), %s174_s29, 32  }
  0x44   : > { %609 = vsyncadd (%p756_p6), %s174_s29, 4294967264  ;;  %s199_s0 = sand.u32 1, %s620_s17   ;;  %p202_p4 = scmp.lt.s32.totalorder %s644_s22, 7 }
  0x45   : > { %s371_s23 = sshll.u32 %s199_s0, 1  ;;  %p372_p5 = scmp.ne.s32.totalorder %s640_s21, 0 }
  0x46   : > { %s203_s24 = scalar_select %p202_p4, %s644_s22, 7 }
  0x47   : > { %s829_s12 = scalar_lea.vmem [#allocation7], %s371_s23  ;;  %211 = sbr.rel (%p372_p5) target bundleno = 80 (0x50), region = 36 }
  0x48   : > { %s204_s5 = scalar_lea.vmem %s901_s1, %s203_s24 }
  0x4c   : > { %v212_v0 = vlaneseq  ;;  %v659_v1 = vmov 0.0  }
  0x4e   : > { %vm214_vm0 = vcmp.lt.s32.totalorder %v212_v0, 256 }
  0x4f   : > { %216 = vst.msk [vmem:[%s829_s12] sm:$0x3] %vm214_vm0, %v659_v1 }
  0x50 PF: > { %v218_v3 = vld [vmem:[%s177_s19] sm:$0x3]  ;;  %v220_v4 = vlaneseq  ;;  %p373_p6 = scmp.ne.s32.totalorder %s640_s21, 7 }
  0x52   : > { %vm834_vm1 = vcmp.lt.s32.totalorder %v220_v4, 256 }
  0x55   : > { %228 = sbr.rel (%p373_p6) target bundleno = 230 (0xe6), region = 40 }
  0x56   : > { %v217_v2 = vld [vmem:[%s829_s12] sm:$0x3] }
  0x57   : > { %v219_v5 = vadd.f32 %v218_v3, %v217_v2 }
  0x59   : > { %224 = vst.msk [vmem:[%s829_s12] sm:$0x3] %vm834_vm1, %v219_v5 }
  0x5a   : > { %v229_v7 = vld [vmem:[%s204_s5] sm:$0x1]  ;;  %v660_v8 = vmov 0  }
  0x5b   : > { %487 = vset.pattern.permute.xlu0 %v660_v8  ;;  %v230_v9 = vadd.f32 1e-12, %v229_v7 }
  0x5d   : > { %488 = vrcp.f32 %v230_v9  ;;  %v242_v12 = vand.u32 2147483648, %v230_v9  ;;  %vm236_vm2 = vweird.f32 %v230_v9  ;;  %v240_v14 = vand.u32 2147483647, %v230_v9 }
  0x5f   : > { %v243_v16 = vor.u32 1.1754944e-38, %v242_v12  ;;  %vm241_vm5 = vcmp.eq.f32.partialorder %v240_v14, 8.507059e+37 }
  0x60   : > { %v245_v20 = vld [vmem:[%s829_s12] sm:$0x3] }
  0x63   : > { %v489_v10 = vpop.eup %488 }
  0x64   : > { %v232_v11 = vmul.f32 %v489_v10, %v230_v9  ;;  %vm237_vm3 = vweird.f32 %v489_v10 }
  0x65   : > { %vm238_vm4 = vmor %vm236_vm2, %vm237_vm3 }
  0x66   : > { %v233_v13 = vsub.f32 1.0, %v232_v11 }
  0x68   : > { %v234_v15 = vmul.f32 %v489_v10, %v233_v13 }
  0x6a   : > { %v235_v17 = vadd.f32 %v489_v10, %v234_v15 }
  0x6c   : > { %v239_v18 = vsel %vm238_vm4, %v489_v10, %v235_v17 }
  0x6d   : > { %v244_v19 = vsel %vm241_vm5, %v243_v16, %v239_v18 }
  0x6e   : > { %248 = vperm.xlu0 %487, %v244_v19  }
  0xe0   : > { %v249_v21 = vpop.permute.xlu0 %248 }
  0xe1   : > { %v251_v22 = vperm.slane %v249_v21, 0 }
  0xe3   : > { %v252_v23 = vmul.f32 %v251_v22, %v245_v20 }
  0xe5   : > { %253 = vst.msk [vmem:[%s829_s12] sm:$0x3] %vm834_vm1, %v252_v23 }
  0xe6 PF: > { %s375_s21 = sshll.u32 %s644_s22, 1  ;;  %s267_s8 = sshll.u32 %s829_s12, 4  ;;  %s268_s8 = int_to_ptr.vmem [resolvable:$true] %s267_s8 }
  0xe7   : > { %s265_s4 = scalar_lea.hbm %s903_s3, %s375_s21  ;;  %s255_s10 = scalar_lea.sflag [#allocation6], %s199_s0 }
  0xe8   : > { %s269_s9 = sshll.u32 %s265_s4, 4  ;;  %s552_s22 = scalar_lea.hbm %s903_s3, 16  ;;  %s270_s9 = int_to_ptr.hbm [resolvable:$true] %s269_s9 }
  0xe9   : > { %s546_s11 = sshra.s32 %s270_s9, 4  ;;  %s547_s11 = int_to_ptr.hbm [resolvable:$true] %s546_s11 }
  0xea   : > { %s548_s27 = scalar_lea.hbm %s547_s11, 2  ;;  %p553_p10 = scmp.lt.s32.totalorder %s547_s11, %s903_s3 }
  0xeb   : > { %p549_p7 = scmp.ne.s32.totalorder %s547_s11, %s548_s27  ;;  %p554_p11 = scmp.lt.s32.totalorder %s552_s22, %s548_s27 }
  0xed   : > { %p550_p8 = pnand %p549_p7, %p772_p12  ;;  %p555_p13 = por %p554_p11, %p553_p10 }
  0xef   : > { %p551_p9 = pneg %p550_p8 }
  0xf1   : > { %p556_p1 = pnand %p555_p13, %p551_p9 }
  0xf3   : > { %559 = shalt.err (!%p556_p1)
}
  0xf4   : > { %382 = dma.vmem_to_hbm [thread:$0]  (%p772_p12), %s268_s8, 32, %s270_s9, %s255_s10  }
  0xf5 PF: > { %p395_p3 = scmp.ge.s32.totalorder %s656_s25, 2  ;;  %s281_s0 = sand.u32 1, %s616_s16  }
  0xf6   : > { %s282_s24 = scalar_lea.sflag [#allocation6], %s281_s0 }
  0xf7   : > { %p391_p2 = pnand %p395_p3, %p781_p0 }
  0xf9   : > { %p392_p4 = pneg %p391_p2 }
  0xfb   : > { %611 = dma.done.wait (%p392_p4), %s282_s24, 32  }
  0xfc   : > { %613 = vsyncadd (%p392_p4), %s282_s24, 4294967264  ;;  %s27_s25 = sadd.s32 1, %s656_s25   ;;  %s922_s14 = sld [smem:[#allocation13_spill]] }
  0xfd   : > { %p24_p5 = scmp.ge.s32.totalorder %s27_s25, 66   ;;  %s923_s0 = sld [smem:[#allocation18_spill]] }
  0xfe   : > { %s924_s21 = sld [smem:[#allocation14_spill]]  ;;  %s928_s16 = smov %s620_s17 }
  0xff   : > { %s925_s22 = sld [smem:[#allocation15_spill]]  ;;  %s929_s17 = smov %s624_s18 }
 0x100   : > { %s926_s23 = sld [smem:[#allocation16_spill]]  ;;  %s930_s18 = smov %s766_s13 }
 0x101   : > { %s927_s24 = sld [smem:[#allocation17_spill]]  ;;  %s931_s19 = smov %s632_s20 }
 0x102   : > { %s932_s20 = smov %s922_s14  ;;  %26 = sbr.rel (!%p24_p5) target bundleno = 15 (0xf), region = 84 }
 0x107   :  { %288 = vsyncpa [#allocation5], 1 }
 0x108   :  { %290 = vsyncpa [#allocation5 + $0x1], 1 }
 0x109   :  { %291 = vsyncpa [#allocation6], 1 }
 0x10a   :  { %293 = vsyncpa [#allocation6 + $0x1], 1 }

</bundles_post_ra>
